<compile_context>
chip_gen: v7x
topology: tpu7x:2x2x1
jax: 0.10.0
libtpu: 0.0.40
codegen_flags: <defaults>
</compile_context>

<pallas_src>
import jax
import jax.numpy as jnp
from jax.experimental import pallas as pl
from jax.experimental.pallas import tpu as pltpu


def _round_up(v, m):
    return (v + m - 1) // m * m


def _patch_embed_kernel(p_ref, w_ref, b_ref, o_ref):
    # p_ref: (tm, K) patch tile, w_ref: (K, tn) weight tile (resident across
    # the inner M loop), b_ref: (1, tn) bias tile, o_ref: (tm, tn) output.
    acc = jnp.dot(p_ref[...], w_ref[...], preferred_element_type=jnp.float32)
    o_ref[...] = (acc + b_ref[...].astype(jnp.float32)).astype(o_ref.dtype)


def patch_embed(x, weight, bias, patch_size, *, compute_dtype=None):
    """PatchEmbed forward.

    x:      (B, C, H, W)   NCHW, like the PyTorch module
    weight: (E, C, p, p)   Conv2d weight layout
    bias:   (E,)           Conv2d bias
    compute_dtype: dtype for the MXU inputs (e.g. jnp.bfloat16 on v6e/v7x);
                   accumulation is always f32.
    returns (B, num_patches, E) in x.dtype
    """
    B, C, H, W = x.shape
    p = patch_size
    E = weight.shape[0]
    assert H % p == 0 and W % p == 0
    Hp, Wp = H // p, W // p
    num_patches = Hp * Wp
    K = C * p * p
    M = B * num_patches

    cdt = x.dtype if compute_dtype is None else compute_dtype
    out_dtype = x.dtype

    # ---- patch extraction: layout-only, fused into the pallas_call input ----
    # (B, C, Hp, p, Wp, p) -> (B, Hp, Wp, C, p, p) -> (M, K); same (c,kh,kw)
    # flattening order as the Conv2d weight below.
    patches = x.reshape(B, C, Hp, p, Wp, p)
    patches = jnp.transpose(patches, (0, 2, 4, 1, 3, 5))
    patches = patches.reshape(M, K).astype(cdt)
    # TODO(synk): for maximum fusion-independence, move patch extraction fully
    # in-kernel (strip-wise (1,C,p,W) BlockSpec + in-VMEM rearrange).

    w_mat = weight.reshape(E, K).T.astype(cdt)          # (K, E)
    b_mat = bias.reshape(1, E).astype(jnp.float32)      # (1, E)

    # ---- tile sizes ----
    E_pad = _round_up(E, 128)                 # lane-dense output last dim
    tn = 256 if E_pad % 256 == 0 else 128     # 256-aligned for v6e/v7x MXU
    tm = min(512, _round_up(M, 8))            # keeps 2x-buffered VMEM small
    M_pad = _round_up(M, tm)

    if E_pad != E:
        w_mat = jnp.pad(w_mat, ((0, 0), (0, E_pad - E)))
        b_mat = jnp.pad(b_mat, ((0, 0), (0, E_pad - E)))
    if M_pad != M:
        patches = jnp.pad(patches, ((0, M_pad - M), (0, 0)))

    n_m = M_pad // tm
    n_e = E_pad // tn
    grid = (n_e, n_m)  # M innermost: weight tile resident, patches streamed

    itemsize = jnp.dtype(cdt).itemsize
    cost = pl.CostEstimate(
        flops=2 * M_pad * K * E_pad,
        transcendentals=0,
        bytes_accessed=(M_pad * K * itemsize            # patches read
                        + K * E_pad * itemsize          # weight read
                        + M_pad * E_pad * jnp.dtype(out_dtype).itemsize),
    )

    out = pl.pallas_call(
        _patch_embed_kernel,
        out_shape=jax.ShapeDtypeStruct((M_pad, E_pad), out_dtype),
        grid=grid,
        in_specs=[
            pl.BlockSpec((tm, K), lambda j, i: (i, 0)),   # patches: streamed
            pl.BlockSpec((K, tn), lambda j, i: (0, j)),   # weight: resident
            pl.BlockSpec((1, tn), lambda j, i: (0, j)),   # bias
        ],
        out_specs=pl.BlockSpec((tm, tn), lambda j, i: (i, j)),
        compiler_params=pltpu.CompilerParams(
            dimension_semantics=("parallel", "parallel"),  # megacore on v7x
            vmem_limit_bytes=64 * 1024 * 1024,
            allow_input_fusion=[True, False, False],       # fuse patch layout
        ),
        cost_estimate=cost,
    )(patches, w_mat, b_mat)

    out = out[:M, :E]
    return out.reshape(B, num_patches, E)


if __name__ == "__main__":
    # Small shapes consistent with the module: img_size=16, patch_size=8,
    # in_chans=4, embed_dim=32  ->  num_patches = 4.
    B, C, H, W = 2, 4, 16, 16
    p = 8
    E = 32

    key = jax.random.PRNGKey(0)
    kx, kw, kb = jax.random.split(key, 3)
    x = jax.random.normal(kx, (B, C, H, W), dtype=jnp.float32)
    weight = jax.random.normal(kw, (E, C, p, p), dtype=jnp.float32) * 0.02
    bias = jax.random.normal(kb, (E,), dtype=jnp.float32) * 0.02

    # plain-JAX strided-conv reference
    ref = jax.lax.conv_general_dilated(
        x, weight, window_strides=(p, p), padding="VALID",
        dimension_numbers=("NCHW", "OIHW", "NCHW"))
    ref = ref + bias[None, :, None, None]
    ref = ref.reshape(B, E, -1).transpose(0, 2, 1)

    # f32 compute path (tight check)
    out = jax.jit(lambda a, w, b: patch_embed(a, w, b, p))(x, weight, bias)
    out = jax.block_until_ready(out)
    assert out.shape == (B, (H // p) * (W // p), E)
    assert jnp.allclose(out, ref, atol=1e-4, rtol=1e-4)

    # bf16 compute path (recommended on v6e/v7x): f32 accumulation, loose check
    out_bf16 = jax.jit(
        lambda a, w, b: patch_embed(a, w, b, p, compute_dtype=jnp.bfloat16)
    )(x, weight, bias)
    out_bf16 = jax.block_until_ready(out_bf16)
    assert jnp.allclose(out_bf16, ref, atol=3e-2, rtol=3e-2)

    print("KERNEL_OK")
</pallas_src>

<mosaic_0001>
module attributes {stable_mosaic.version = 11 : i64} {
  func.func @_patch_embed_kernel(%arg0: i32, %arg1: i32, %arg2: memref<8x256xf32, #tpu.memory_space<vmem>>, %arg3: memref<256x128xf32, #tpu.memory_space<vmem>>, %arg4: memref<1x128xf32, #tpu.memory_space<vmem>>, %arg5: memref<8x128xf32, #tpu.memory_space<vmem>>) attributes {dimension_semantics = [#tpu.dimension_semantics<parallel>, #tpu.dimension_semantics<parallel>], iteration_bounds = array<i64: 1, 1>, scalar_prefetch = 0 : i64, scratch_operands = 0 : i64, tpu.core_type = #tpu.core_type<tc>, window_params = [{transform_indices = @transform_0, window_bounds = array<i64: 8, 256>}, {transform_indices = @transform_1, window_bounds = array<i64: 256, 128>}, {transform_indices = @transform_2, window_bounds = array<i64: 1, 128>}, {transform_indices = @transform_3, window_bounds = array<i64: 8, 128>}]} {
    %c0 = arith.constant 0 : index
    %c0_0 = arith.constant 0 : index
    %0 = vector.load %arg2[%c0, %c0_0] : memref<8x256xf32, #tpu.memory_space<vmem>>, vector<8x256xf32>
    %c0_1 = arith.constant 0 : index
    %c0_2 = arith.constant 0 : index
    %1 = vector.load %arg3[%c0_1, %c0_2] : memref<256x128xf32, #tpu.memory_space<vmem>>, vector<256x128xf32>
    %cst = arith.constant dense<0.000000e+00> : vector<8x128xf32>
    %2 = tpu.matmul %0, %1, %cst {dimension_numbers = #tpu.dot_dimension_numbers<[1], [0], [0], [1], [0, 0, 1, 1], [], []>} : vector<8x256xf32>, vector<256x128xf32>, vector<8x128xf32> -> vector<8x128xf32>
    %c0_3 = arith.constant 0 : index
    %c0_4 = arith.constant 0 : index
    %3 = vector.load %arg4[%c0_3, %c0_4] : memref<1x128xf32, #tpu.memory_space<vmem>>, vector<1x128xf32>
    %4 = vector.broadcast %3 : vector<1x128xf32> to vector<8x128xf32>
    %5 = arith.addf %2, %4 : vector<8x128xf32>
    %c0_5 = arith.constant 0 : index
    %c0_6 = arith.constant 0 : index
    %6 = vector.load %arg5[%c0_5, %c0_6] : memref<8x128xf32, #tpu.memory_space<vmem>>, vector<8x128xf32>
    tpu.vector_store %arg5[%c0_5, %c0_6], %5 {strides = array<i32>} : memref<8x128xf32, #tpu.memory_space<vmem>>, vector<8x128xf32>,
    return
  }
  func.func @transform_0(%arg0: i32, %arg1: i32) -> (i32, i32) {
    %c0_i32 = arith.constant 0 : i32
    %c0_i32_0 = arith.constant 0 : i32
    return %arg1, %c0_i32 : i32, i32
  }
  func.func @transform_1(%arg0: i32, %arg1: i32) -> (i32, i32) {
    %c0_i32 = arith.constant 0 : i32
    %c0_i32_0 = arith.constant 0 : i32
    return %c0_i32, %arg0 : i32, i32
  }
  func.func @transform_2(%arg0: i32, %arg1: i32) -> (i32, i32) {
    %c0_i32 = arith.constant 0 : i32
    %c0_i32_0 = arith.constant 0 : i32
    return %c0_i32, %arg0 : i32, i32
  }
  func.func @transform_3(%arg0: i32, %arg1: i32) -> (i32, i32) {
    %c0_i32 = arith.constant 0 : i32
    return %arg1, %arg0 : i32, i32
  }
}

</mosaic_0001>

<bundles_post_ra>
// kernel: _lambda_.1
= control target key start
LH: loop header
LB: loop body
LE: loop exit
PB: predicated region body
PF: predicated region fallthrough
CT: control target
= control target key end

     0   :  { %8 = vsyncpa [#allocation3], 0  ;;  %s422_s0 = inlined_call_operand.hbm [shape: f32[8,256], index: 0, kind: input, shape index: {}]   ;;  %s423_s1 = inlined_call_operand.hbm [shape: f32[256,128], index: 1, kind: input, shape index: {}]   ;;  %s424_s2 = inlined_call_operand.hbm [shape: f32[1,128], index: 2, kind: input, shape index: {}]   ;;  %s425_s3 = inlined_call_operand.hbm [shape: f32[8,128], index: 3, kind: output, shape index: {}]  }
   0x1   :  { %9 = vsyncpa [#allocation6], 0 }
   0x2   :  { %10 = vsyncpa [#allocation4], 0  ;;  %s348_s12 = smov [#allocation5]   ;;  %s254_s16 = scalar_lea.hbm %s423_s1, 4096 }
   0x3   :  { %s26_s13 = sshll.u32 %s348_s12, 4  ;;  %p255_p0 = scmp.ne.s32.totalorder %s423_s1, %s254_s16  ;;  %s27_s13 = int_to_ptr.vmem [resolvable:$true] %s26_s13 }
   0x4   :  { %p258_p1 = scmp.lt.u32.totalorder %s254_s16, %s423_s1 }
   0x6   :  { %p260_p2 = pnand %p258_p1, %p255_p0 }
   0x8   :  { %263 = shalt.err (!%p260_p2)
}
   0x9   :  { %s264_s21 = scalar_lea.vmem %s27_s13, 4096  ;;  %p269_p4 = scmp.lt.s32.totalorder %s27_s13, %s27_s13 }
   0xa   :  { %p265_p3 = scmp.ne.s32.totalorder %s27_s13, %s264_s21  ;;  %p270_p5 = scmp.lt.s32.totalorder %s264_s21, %s264_s21 }
   0xc   :  { %p271_p6 = por %p270_p5, %p269_p4 }
   0xe   :  { %p272_p7 = pnand %p271_p6, %p265_p3 }
  0x10   :  { %275 = shalt.err (!%p272_p7)
}
  0x11   :  { %s349_s22 = smov 128   ;;  %s350_s23 = smov 8  }
  0x12   :  { %32 = dma.hbm_to_vmem [thread:$0]  %s423_s1, 4096, %s27_s13, [#allocation6], %s349_s22, %s349_s22, %s350_s23  }
  0x13   :  { %s351_s26 = smov [#allocation2]   ;;  %s352_s28 = smov [#allocation7]  }
  0x14   :  { %s17_s27 = sshll.u32 %s351_s26, 4  ;;  %s39_s29 = sshll.u32 %s352_s28, 4  ;;  %s18_s27 = int_to_ptr.vmem [resolvable:$true] %s17_s27  ;;  %s40_s29 = int_to_ptr.vmem [resolvable:$true] %s39_s29 }
  0x15   :  { %s276_s5 = scalar_lea.hbm %s422_s0, 256 }
  0x16   :  { %p277_p8 = scmp.ne.s32.totalorder %s422_s0, %s276_s5  ;;  %p280_p9 = scmp.lt.u32.totalorder %s276_s5, %s422_s0 }
  0x18   :  { %p282_p10 = pnand %p280_p9, %p277_p8 }
  0x1a   :  { %285 = shalt.err (!%p282_p10)
}
  0x1b   :  { %s286_s1 = scalar_lea.vmem %s18_s27, 256  ;;  %p291_p12 = scmp.lt.s32.totalorder %s18_s27, %s18_s27 }
  0x1c   :  { %p287_p11 = scmp.ne.s32.totalorder %s18_s27, %s286_s1  ;;  %p292_p13 = scmp.lt.s32.totalorder %s286_s1, %s286_s1 }
  0x1e   :  { %p293_p0 = por %p292_p13, %p291_p12 }
  0x20   :  { %p294_p1 = pnand %p293_p0, %p287_p11 }
  0x22   :  { %297 = shalt.err (!%p294_p1)
}
  0x23   :  { %20 = dma.hbm_to_vmem [thread:$0]  %s422_s0, 256, %s18_s27, [#allocation3]  }
  0x24   :  { %s298_s14 = scalar_lea.hbm %s424_s2, 16 }
  0x25   :  { %p299_p2 = scmp.ne.s32.totalorder %s424_s2, %s298_s14  ;;  %p302_p3 = scmp.lt.u32.totalorder %s298_s14, %s424_s2 }
  0x27   :  { %p304_p4 = pnand %p302_p3, %p299_p2 }
  0x29   :  { %307 = shalt.err (!%p304_p4)
}
  0x2a   :  { %s308_s19 = scalar_lea.vmem %s40_s29, 16  ;;  %s312_s20 = scalar_lea.vmem %s40_s29, 32 }
  0x2b   :  { %p309_p5 = scmp.ne.s32.totalorder %s40_s29, %s308_s19  ;;  %p313_p6 = scmp.lt.s32.totalorder %s40_s29, %s40_s29 }
  0x2c   :  { %p314_p7 = scmp.lt.s32.totalorder %s312_s20, %s308_s19 }
  0x2e   :  { %p315_p8 = por %p314_p7, %p313_p6 }
  0x30   :  { %p316_p9 = pnand %p315_p8, %p309_p5 }
  0x32   :  { %319 = shalt.err (!%p316_p9)
}
  0x33   :  { %42 = dma.hbm_to_vmem [thread:$0]  %s424_s2, 16, %s40_s29, [#allocation6]  }
  0x34   :  { %342 = dma.done.wait [#allocation3], 256  }
  0x35   :  { %343 = vsyncadd [#allocation3], 4294967040 }
  0x36   :  { %344 = dma.done.wait [#allocation6], 4112  }
  0x37   :  { %345 = vsyncadd [#allocation6], 4294963184  ;;  %v70_v0 = vld [vmem:[#allocation5 + $0x80] sm:$0xff]  ;;  %v71_v1 = vld [vmem:[#allocation5 + $0x88] sm:$0xff]  ;;  %s353_s2 = smov [#allocation8]  }
  0x38   :  { %v54_v2 = vld [vmem:[#allocation5] sm:$0xff]  ;;  %v216_v3 = vpack.c.bf16 %v71_v1, %v70_v0  ;;  %v55_v4 = vld [vmem:[#allocation5 + $0x8] sm:$0xff]  ;;  %v72_v5 = vld [vmem:[#allocation5 + $0x90] sm:$0xff]  ;;  %s170_s22 = sshll.u32 %s353_s2, 4  ;;  %s171_s22 = int_to_ptr.vmem [resolvable:$true] %s170_s22 }
  0x39   :  { %v73_v6 = vld [vmem:[#allocation5 + $0x98] sm:$0xff]  ;;  %v218_v7 = vpack.c.bf16 %v55_v4, %v54_v2  ;;  %v56_v9 = vld [vmem:[#allocation5 + $0x10] sm:$0xff]  ;;  %v74_v11 = vld [vmem:[#allocation5 + $0xa0] sm:$0xff]  ;;  %s320_s23 = scalar_lea.vmem %s171_s22, 128  ;;  %p325_p11 = scmp.lt.s32.totalorder %s171_s22, %s171_s22 }
  0x3a   :  { %v220_v8 = vpack.c.bf16 %v73_v6, %v72_v5  ;;  %v57_v10 = vld [vmem:[#allocation5 + $0x18] sm:$0xff]  ;;  %217 = vmatprep.subr.bf16.mxu0 %v216_v3  ;;  %v75_v12 = vld [vmem:[#allocation5 + $0xa8] sm:$0xff]  ;;  %v58_v15 = vld [vmem:[#allocation5 + $0x20] sm:$0xff]  ;;  %p321_p10 = scmp.ne.s32.totalorder %s171_s22, %s320_s23  ;;  %p326_p12 = scmp.lt.s32.totalorder %s320_s23, %s320_s23 }
  0x3b   :  { %219 = vmatpush3.bf16.msra.mxu0 %v218_v7  ;;  %v222_v13 = vpack.c.bf16 %v57_v10, %v56_v9  ;;  %v224_v14 = vpack.c.bf16 %v75_v12, %v74_v11  ;;  %v59_v16 = vld [vmem:[#allocation5 + $0x28] sm:$0xff]  ;;  %v76_v17 = vld [vmem:[#allocation5 + $0xb0] sm:$0xff]  ;;  %v77_v18 = vld [vmem:[#allocation5 + $0xb8] sm:$0xff] }
  0x3c   :  { %221 = vmatprep.subr.bf16.mxu0 %v220_v8  ;;  %v226_v19 = vpack.c.bf16 %v59_v16, %v58_v15  ;;  %v228_v20 = vpack.c.bf16 %v77_v18, %v76_v17  ;;  %v60_v21 = vld [vmem:[#allocation5 + $0x30] sm:$0xff]  ;;  %v61_v22 = vld [vmem:[#allocation5 + $0x38] sm:$0xff]  ;;  %v78_v23 = vld [vmem:[#allocation5 + $0xc0] sm:$0xff]  ;;  %p327_p13 = por %p326_p12, %p325_p11 }
  0x3d   :  { %v79_v24 = vld [vmem:[#allocation5 + $0xc8] sm:$0xff]  ;;  %v53_v25 = vld [vmem:[#allocation2 + $0x8] sm:$0xff]  ;;  %v230_v26 = vpack.c.bf16 %v61_v22, %v60_v21  ;;  %v62_v28 = vld [vmem:[#allocation5 + $0x40] sm:$0xff] }
  0x3e   :  { %157 = vmatprep.mubr.f32.mxu0 %v53_v25  ;;  %v232_v27 = vpack.c.bf16 %v79_v24, %v78_v23  ;;  %v63_v29 = vld [vmem:[#allocation5 + $0x48] sm:$0xff]  ;;  %v80_v30 = vld [vmem:[#allocation5 + $0xd0] sm:$0xff]  ;;  %v81_v31 = vld [vmem:[#allocation5 + $0xd8] sm:$0xff]  ;;  %p328_p0 = pnand %p327_p13, %p321_p10 }
  0x3f   :  { %223 = vmatpush3.bf16.msra.mxu0 %v222_v13  ;;  %v234_v32 = vpack.c.bf16 %v63_v29, %v62_v28  ;;  %v236_v33 = vpack.c.bf16 %v81_v31, %v80_v30  ;;  %v64_v34 = vld [vmem:[#allocation5 + $0x50] sm:$0xff]  ;;  %v65_v35 = vld [vmem:[#allocation5 + $0x58] sm:$0xff]  ;;  %v82_v36 = vld [vmem:[#allocation5 + $0xe0] sm:$0xff] }
  0x40   :  { %225 = vmatprep.subr.bf16.mxu0 %v224_v14  ;;  %v83_v37 = vld [vmem:[#allocation5 + $0xe8] sm:$0xff]  ;;  %v238_v38 = vpack.c.bf16 %v65_v35, %v64_v34  ;;  %v66_v40 = vld [vmem:[#allocation5 + $0x60] sm:$0xff]  ;;  %v84_v42 = vld [vmem:[#allocation5 + $0xf0] sm:$0xff] }
  0x41   :  { %v240_v39 = vpack.c.bf16 %v83_v37, %v82_v36  ;;  %v67_v41 = vld [vmem:[#allocation5 + $0x68] sm:$0xff]  ;;  %v85_v43 = vld [vmem:[#allocation5 + $0xf8] sm:$0xff]  ;;  %v68_v46 = vld [vmem:[#allocation5 + $0x70] sm:$0xff] }
  0x42   :  { %v242_v44 = vpack.c.bf16 %v67_v41, %v66_v40  ;;  %v244_v45 = vpack.c.bf16 %v85_v43, %v84_v42  ;;  %v69_v47 = vld [vmem:[#allocation5 + $0x78] sm:$0xff]  ;;  %v52_v49 = vld [vmem:[#allocation2] sm:$0xff]  ;;  %v180_v51 = vld [vmem:[#allocation7] ss:$0 sm:$0xff] }
  0x43   :  { %227 = vmatpush3.bf16.msra.mxu0 %v226_v19  ;;  %v246_v48 = vpack.c.bf16 %v69_v47, %v68_v46 }
  0x44   :  { %229 = vmatprep.subr.bf16.mxu0 %v228_v20 }
  0x47   :  { %231 = vmatpush3.bf16.msra.mxu0 %v230_v26 }
  0x48   :  { %233 = vmatprep.subr.bf16.mxu0 %v232_v27 }
  0x4b   :  { %235 = vmatpush3.bf16.msra.mxu0 %v234_v32 }
  0x4c   :  { %237 = vmatprep.subr.bf16.mxu0 %v236_v33 }
  0x4f   :  { %239 = vmatpush3.bf16.msra.mxu0 %v238_v38 }
  0x50   :  { %241 = vmatprep.subr.bf16.mxu0 %v240_v39 }
  0x53   :  { %243 = vmatpush3.bf16.msra.mxu0 %v242_v44 }
  0x54   :  { %245 = vmatprep.subr.bf16.mxu0 %v244_v45 }
  0x57   :  { %247 = vmatpush3.bf16.msra.mxu0 %v246_v48 }
  0x5a   :  { %158 = vmatmul.mubr.f32.vlgmr.msra.gmra.mrb[0].mxu0 %v52_v49 }
 0x12d   :  { %v213_v50 = vpop.f32.mrb[0].mxu0 }
 0x12e   :  { %v214_v52 = vpop.f32.mrb[1].mxu0 }
 0x12f   :  { %v215_v53 = vadd.f32 %v214_v52, %v213_v50 }
 0x131   :  { %v160_v54 = vadd.f32 %v215_v53, %v180_v51 }
 0x133   :  { %163 = vst [vmem:[#allocation8] sm:$0xff] %v160_v54 }
 0x134   :  { %331 = shalt.err (!%p328_p0)
}
 0x135   :  { %s332_s26 = scalar_lea.hbm %s425_s3, 128 }
 0x136   :  { %p333_p1 = scmp.ne.s32.totalorder %s425_s3, %s332_s26  ;;  %p336_p2 = scmp.lt.u32.totalorder %s332_s26, %s425_s3 }
 0x138   :  { %p338_p3 = pnand %p336_p2, %p333_p1 }
 0x13a   :  { %341 = shalt.err (!%p338_p3)
}
 0x13b   :  { %173 = dma.vmem_to_hbm [thread:$0]  %s171_s22, 128, %s425_s3, [#allocation4]  }
 0x13c   :  { %346 = dma.done.wait [#allocation4], 128  }
 0x13d   :  { %347 = vsyncadd [#allocation4], 4294967168 }
 0x13e   :  { %177 = vsyncpa [#allocation3], 1 }
 0x13f   :  { %178 = vsyncpa [#allocation6], 1 }
 0x140   :  { %179 = vsyncpa [#allocation4], 1 }

</bundles_post_ra>
